<compile_context>
chip_gen: v7x
topology: tpu7x:2x2x1
jax: 0.10.0
libtpu: 0.0.40
codegen_flags: <defaults>
</compile_context>

<pallas_src>
import math

import jax
import jax.numpy as jnp
from jax import lax
from jax.experimental import pallas as pl
from jax.experimental.pallas import tpu as pltpu


def _gelu_tanh(x):
    # Matches torch.nn.functional.gelu(..., approximate='tanh')
    c = math.sqrt(2.0 / math.pi)
    return 0.5 * x * (1.0 + jnp.tanh(c * (x + 0.044715 * x * x * x)))


def _round_up(x, m):
    return ((x + m - 1) // m) * m


def siglip_mlp_kernel(x_ref, w1_ref, b1_ref, w2_ref, b2_ref, out_ref, acc_ref):
    # x_ref:   [TM, H]    token tile (native dtype)
    # w1_ref:  [TI, H]    fc1 weight slab (native PyTorch layout, native dtype)
    # b1_ref:  [1,  TI]
    # w2_ref:  [H,  TI]   fc2 weight slab (native PyTorch layout, native dtype)
    # b2_ref:  [1,  H]
    # out_ref: [TM, H]
    # acc_ref: [TM, H]    f32 accumulator (VMEM scratch)
    k = pl.program_id(1)

    @pl.when(k == 0)
    def _init():
        # Fold the fc2 bias into the accumulator init (f32).
        acc_ref[...] = jnp.broadcast_to(
            b2_ref[...].astype(jnp.float32), acc_ref.shape
        )

    # fc1 slab: [TM, H] x [TI, H] contracted on H -> [TM, TI], f32 accum on MXU.
    h = lax.dot_general(
        x_ref[...], w1_ref[...],
        dimension_numbers=(((1,), (1,)), ((), ())),
        preferred_element_type=jnp.float32,
    )
    h = h + b1_ref[...].astype(jnp.float32)
    h = _gelu_tanh(h)                       # VPU/EUP work, hidden under MXU

    # fc2 partial: [TM, TI] x [H, TI] contracted on TI -> [TM, H], f32 accum.
    partial = lax.dot_general(
        h.astype(w2_ref.dtype), w2_ref[...],
        dimension_numbers=(((1,), (1,)), ((), ())),
        preferred_element_type=jnp.float32,
    )
    acc_ref[...] += partial

    @pl.when(k == pl.num_programs(1) - 1)
    def _finalize():
        out_ref[...] = acc_ref[...].astype(out_ref.dtype)


def siglip_mlp(hidden_states, w1, b1, w2, b2, *, tm=512, ti=512,
               vmem_limit_bytes=64 * 1024 * 1024):
    """SigLipMLP forward.

    hidden_states: [B, S, H]
    w1: [I, H], b1: [I]   (fc1, PyTorch nn.Linear layout)
    w2: [H, I], b2: [H]   (fc2, PyTorch nn.Linear layout)
    """
    B, S, H = hidden_states.shape
    I, H2 = w1.shape
    assert H2 == H and w2.shape == (H, I)
    assert b1.shape == (I,) and b2.shape == (H,)
    M = B * S
    out_dtype = hidden_states.dtype

    # Tile sizes: respect the (8, 128) sublane/lane constraint, don't exceed
    # the (padded) problem size.
    tm_eff = min(tm, _round_up(M, 8))
    ti_eff = min(ti, _round_up(I, 128))
    m_pad = _round_up(M, tm_eff)
    i_pad = _round_up(I, ti_eff)

    x2d = hidden_states.reshape(M, H)
    if m_pad != M:
        x2d = jnp.pad(x2d, ((0, m_pad - M), (0, 0)))
    if i_pad != I:
        # Zero padding of the intermediate dim is exact: gelu(0 + 0) = 0 and
        # the matching fc2 columns are zero, so padded slabs contribute nothing.
        w1 = jnp.pad(w1, ((0, i_pad - I), (0, 0)))
        b1 = jnp.pad(b1, ((0, i_pad - I),))
        w2 = jnp.pad(w2, ((0, 0), (0, i_pad - I)))

    b1_2d = b1.reshape(1, i_pad)
    b2_2d = b2.reshape(1, H)

    n_m = m_pad // tm_eff
    n_k = i_pad // ti_eff

    w_itemsize = jnp.dtype(w1.dtype).itemsize
    x_itemsize = jnp.dtype(x2d.dtype).itemsize
    cost = pl.CostEstimate(
        flops=4 * m_pad * H * i_pad,                      # two GEMMs
        transcendentals=m_pad * i_pad,                    # one tanh per intermediate elem
        bytes_accessed=int(
            m_pad * H * x_itemsize                        # x in
            + m_pad * H * jnp.dtype(out_dtype).itemsize   # out
            + n_m * 2 * i_pad * H * w_itemsize            # weight slabs per M-tile
            + i_pad * w_itemsize + H * w_itemsize         # biases
        ),
    )

    out2d = pl.pallas_call(
        siglip_mlp_kernel,
        out_shape=jax.ShapeDtypeStruct((m_pad, H), out_dtype),
        grid_spec=pltpu.PrefetchScalarGridSpec(
            num_scalar_prefetch=0,
            grid=(n_m, n_k),                              # (token tiles, I slabs)
            in_specs=[
                pl.BlockSpec((tm_eff, H), lambda i, k: (i, 0)),   # x tile (k-invariant)
                pl.BlockSpec((ti_eff, H), lambda i, k: (k, 0)),   # fc1 weight slab
                pl.BlockSpec((1, ti_eff), lambda i, k: (0, k)),   # fc1 bias slab
                pl.BlockSpec((H, ti_eff), lambda i, k: (0, k)),   # fc2 weight slab
                pl.BlockSpec((1, H),      lambda i, k: (0, 0)),   # fc2 bias (resident)
            ],
            out_specs=pl.BlockSpec((tm_eff, H), lambda i, k: (i, 0)),
            scratch_shapes=[pltpu.VMEM((tm_eff, H), jnp.float32)],
        ),
        compiler_params=pltpu.CompilerParams(
            dimension_semantics=("parallel", "arbitrary"),
            vmem_limit_bytes=vmem_limit_bytes,
        ),
        cost_estimate=cost,
    )(x2d, w1, b1_2d, w2, b2_2d)

    return out2d[:M].reshape(B, S, H)


def reference_mlp(hidden_states, w1, b1, w2, b2):
    x = hidden_states.astype(jnp.float32)
    h = jnp.einsum("bsh,ih->bsi", x, w1.astype(jnp.float32)) + b1.astype(jnp.float32)
    h = _gelu_tanh(h)
    o = jnp.einsum("bsi,hi->bsh", h, w2.astype(jnp.float32)) + b2.astype(jnp.float32)
    return o.astype(hidden_states.dtype)


if __name__ == "__main__":
    # Small config consistent with SigLipVisionConfig(hidden_size, intermediate_size)
    B, S = 2, 8
    HIDDEN = 128          # config.hidden_size
    INTERMEDIATE = 256    # config.intermediate_size

    key = jax.random.PRNGKey(0)
    kx, k1, k2, k3, k4 = jax.random.split(key, 5)

    x = jax.random.normal(kx, (B, S, HIDDEN), dtype=jnp.float32)

    # nn.Linear(hidden, intermediate): weight [I, H], bias [I]
    w1 = jax.random.normal(k1, (INTERMEDIATE, HIDDEN), dtype=jnp.float32) * 0.02
    b1 = jax.random.normal(k2, (INTERMEDIATE,), dtype=jnp.float32) * 0.02
    # nn.Linear(intermediate, hidden): weight [H, I], bias [H]
    w2 = jax.random.normal(k3, (HIDDEN, INTERMEDIATE), dtype=jnp.float32) * 0.02
    b2 = jax.random.normal(k4, (HIDDEN,), dtype=jnp.float32) * 0.02

    # ti=128 so the toy config exercises the I-slab accumulation loop (2 steps).
    out = siglip_mlp(x, w1, b1, w2, b2, tm=512, ti=128)
    out = jax.block_until_ready(out)

    ref = reference_mlp(x, w1, b1, w2, b2)
    assert out.shape == (B, S, HIDDEN)
    assert jnp.allclose(out, ref, atol=1e-4, rtol=1e-4), "mismatch vs reference"

    print("KERNEL_OK")
</pallas_src>

<mosaic_0001>
module attributes {stable_mosaic.version = 11 : i64} {
  func.func @siglip_mlp_kernel(%arg0: i32, %arg1: i32, %arg2: memref<16x128xf32, #tpu.memory_space<vmem>>, %arg3: memref<128x128xf32, #tpu.memory_space<vmem>>, %arg4: memref<1x128xf32, #tpu.memory_space<vmem>>, %arg5: memref<128x128xf32, #tpu.memory_space<vmem>>, %arg6: memref<1x128xf32, #tpu.memory_space<vmem>>, %arg7: memref<16x128xf32, #tpu.memory_space<vmem>>, %arg8: memref<16x128xf32, #tpu.memory_space<vmem>>) attributes {dimension_semantics = [#tpu.dimension_semantics<parallel>, #tpu.dimension_semantics<arbitrary>], iteration_bounds = array<i64: 1, 2>, scalar_prefetch = 0 : i64, scratch_operands = 1 : i64, tpu.core_type = #tpu.core_type<tc>, window_params = [{transform_indices = @transform_0, window_bounds = array<i64: 16, 128>}, {transform_indices = @transform_1, window_bounds = array<i64: 128, 128>}, {transform_indices = @transform_2, window_bounds = array<i64: 1, 128>}, {transform_indices = @transform_3, window_bounds = array<i64: 128, 128>}, {pipeline_mode = #tpu.pipeline_mode<synchronous>, transform_indices = @transform_4, window_bounds = array<i64: 1, 128>}, {transform_indices = @transform_5, window_bounds = array<i64: 16, 128>}]} {
    %c0_i32 = arith.constant 0 : i32
    %0 = arith.cmpi eq, %arg1, %c0_i32 : i32
    %1 = arith.extui %0 : i1 to i32
    %c0_i32_0 = arith.constant 0 : i32
    %2 = arith.cmpi ne, %1, %c0_i32_0 : i32
    scf.if %2 {
      %c0_18 = arith.constant 0 : index
      %c0_19 = arith.constant 0 : index
      %30 = vector.load %arg6[%c0_18, %c0_19] : memref<1x128xf32, #tpu.memory_space<vmem>>, vector<1x128xf32>
      %31 = vector.shape_cast %30 : vector<1x128xf32> to vector<1x128xf32>
      %32 = vector.broadcast %31 : vector<1x128xf32> to vector<16x128xf32>
      %c0_20 = arith.constant 0 : index
      %c0_21 = arith.constant 0 : index
      %33 = vector.load %arg8[%c0_20, %c0_21] : memref<16x128xf32, #tpu.memory_space<vmem>>, vector<16x128xf32>
      tpu.vector_store %arg8[%c0_20, %c0_21], %32 {strides = array<i32>} : memref<16x128xf32, #tpu.memory_space<vmem>>, vector<16x128xf32>,
    } else {
    }
    %c0 = arith.constant 0 : index
    %c0_1 = arith.constant 0 : index
    %3 = vector.load %arg2[%c0, %c0_1] : memref<16x128xf32, #tpu.memory_space<vmem>>, vector<16x128xf32>
    %c0_2 = arith.constant 0 : index
    %c0_3 = arith.constant 0 : index
    %4 = vector.load %arg3[%c0_2, %c0_3] : memref<128x128xf32, #tpu.memory_space<vmem>>, vector<128x128xf32>
    %cst = arith.constant dense<0.000000e+00> : vector<16x128xf32>
    %5 = tpu.matmul %3, %4, %cst {dimension_numbers = #tpu.dot_dimension_numbers<[1], [1], [0], [0], [0, 0, 1, 0], [], []>} : vector<16x128xf32>, vector<128x128xf32>, vector<16x128xf32> -> vector<16x128xf32>
    %c0_4 = arith.constant 0 : index
    %c0_5 = arith.constant 0 : index
    %6 = vector.load %arg4[%c0_4, %c0_5] : memref<1x128xf32, #tpu.memory_space<vmem>>, vector<1x128xf32>
    %7 = vector.broadcast %6 : vector<1x128xf32> to vector<16x128xf32>
    %8 = arith.addf %5, %7 : vector<16x128xf32>
    %cst_6 = arith.constant 5.000000e-01 : f32
    %9 = vector.broadcast %cst_6 : f32 to vector<16x128xf32>
    %10 = arith.mulf %9, %8 : vector<16x128xf32>
    %cst_7 = arith.constant 4.471500e-02 : f32
    %11 = vector.broadcast %cst_7 : f32 to vector<16x128xf32>
    %12 = arith.mulf %11, %8 : vector<16x128xf32>
    %13 = arith.mulf %12, %8 : vector<16x128xf32>
    %14 = arith.mulf %13, %8 : vector<16x128xf32>
    %15 = arith.addf %8, %14 : vector<16x128xf32>
    %cst_8 = arith.constant 0.797884583 : f32
    %16 = vector.broadcast %cst_8 : f32 to vector<16x128xf32>
    %17 = arith.mulf %16, %15 : vector<16x128xf32>
    %18 = math.tanh %17 : vector<16x128xf32>
    %cst_9 = arith.constant 1.000000e+00 : f32
    %19 = vector.broadcast %cst_9 : f32 to vector<16x128xf32>
    %20 = arith.addf %19, %18 : vector<16x128xf32>
    %21 = arith.mulf %10, %20 : vector<16x128xf32>
    %c0_10 = arith.constant 0 : index
    %c0_11 = arith.constant 0 : index
    %22 = vector.load %arg5[%c0_10, %c0_11] : memref<128x128xf32, #tpu.memory_space<vmem>>, vector<128x128xf32>
    %cst_12 = arith.constant dense<0.000000e+00> : vector<16x128xf32>
    %23 = tpu.matmul %21, %22, %cst_12 {dimension_numbers = #tpu.dot_dimension_numbers<[1], [1], [0], [0], [0, 0, 1, 0], [], []>} : vector<16x128xf32>, vector<128x128xf32>, vector<16x128xf32> -> vector<16x128xf32>
    %c0_13 = arith.constant 0 : index
    %c0_14 = arith.constant 0 : index
    %24 = vector.load %arg8[%c0_13, %c0_14] : memref<16x128xf32, #tpu.memory_space<vmem>>, vector<16x128xf32>
    %25 = arith.addf %24, %23 : vector<16x128xf32>
    %c0_15 = arith.constant 0 : index
    %c0_16 = arith.constant 0 : index
    %26 = vector.load %arg8[%c0_15, %c0_16] : memref<16x128xf32, #tpu.memory_space<vmem>>, vector<16x128xf32>
    tpu.vector_store %arg8[%c0_15, %c0_16], %25 {strides = array<i32>} : memref<16x128xf32, #tpu.memory_space<vmem>>, vector<16x128xf32>,
    %c1_i32 = arith.constant 1 : i32
    %27 = arith.cmpi eq, %arg1, %c1_i32 : i32
    %28 = arith.extui %27 : i1 to i32
    %c0_i32_17 = arith.constant 0 : i32
    %29 = arith.cmpi ne, %28, %c0_i32_17 : i32
    scf.if %29 {
      %c0_18 = arith.constant 0 : index
      %c0_19 = arith.constant 0 : index
      %30 = vector.load %arg8[%c0_18, %c0_19] : memref<16x128xf32, #tpu.memory_space<vmem>>, vector<16x128xf32>
      %c0_20 = arith.constant 0 : index
      %c0_21 = arith.constant 0 : index
      %31 = vector.load %arg7[%c0_20, %c0_21] : memref<16x128xf32, #tpu.memory_space<vmem>>, vector<16x128xf32>
      tpu.vector_store %arg7[%c0_20, %c0_21], %30 {strides = array<i32>} : memref<16x128xf32, #tpu.memory_space<vmem>>, vector<16x128xf32>,
    } else {
    }
    return
  }
  func.func @transform_0(%arg0: i32, %arg1: i32) -> (i32, i32) {
    %c0_i32 = arith.constant 0 : i32
    %c0_i32_0 = arith.constant 0 : i32
    return %arg0, %c0_i32 : i32, i32
  }
  func.func @transform_1(%arg0: i32, %arg1: i32) -> (i32, i32) {
    %c0_i32 = arith.constant 0 : i32
    %c0_i32_0 = arith.constant 0 : i32
    return %arg1, %c0_i32 : i32, i32
  }
  func.func @transform_2(%arg0: i32, %arg1: i32) -> (i32, i32) {
    %c0_i32 = arith.constant 0 : i32
    %c0_i32_0 = arith.constant 0 : i32
    return %c0_i32, %arg1 : i32, i32
  }
  func.func @transform_3(%arg0: i32, %arg1: i32) -> (i32, i32) {
    %c0_i32 = arith.constant 0 : i32
    %c0_i32_0 = arith.constant 0 : i32
    return %c0_i32, %arg1 : i32, i32
  }
  func.func @transform_4(%arg0: i32, %arg1: i32) -> (i32, i32) {
    %c0_i32 = arith.constant 0 : i32
    %c0_i32_0 = arith.constant 0 : i32
    %c0_i32_1 = arith.constant 0 : i32
    return %c0_i32, %c0_i32_0 : i32, i32
  }
  func.func @transform_5(%arg0: i32, %arg1: i32) -> (i32, i32) {
    %c0_i32 = arith.constant 0 : i32
    %c0_i32_0 = arith.constant 0 : i32
    return %arg0, %c0_i32 : i32, i32
  }
}

</mosaic_0001>

<bundles_post_ra>
// kernel: tpu_custom_call.1
= control target key start
LH: loop header
LB: loop body
LE: loop exit
PB: predicated region body
PF: predicated region fallthrough
CT: control target
= control target key end

     0   :  { %s1638_s0 = inlined_call_operand.hbm [shape: f32[16,128], index: 0, kind: input, shape index: {}]   ;;  %s1639_s1 = inlined_call_operand.hbm [shape: f32[256,128], index: 1, kind: input, shape index: {}]   ;;  %s1640_s2 = inlined_call_operand.hbm [shape: f32[1,256], index: 2, kind: input, shape index: {}]   ;;  %s1641_s3 = inlined_call_operand.hbm [shape: f32[128,256], index: 3, kind: input, shape index: {}]   ;;  %s1642_s4 = inlined_call_operand.hbm [shape: f32[1,128], index: 4, kind: input, shape index: {}]   ;;  %s1643_s5 = inlined_call_operand.hbm [shape: f32[16,128], index: 5, kind: output, shape index: {}]  }
   0x1   :  { %1657 = sst [smem:[#allocation20_spill]] %s1639_s1 }
   0x2   :  { %1658 = sst [smem:[#allocation21_spill]] %s1642_s4 }
   0x3   :  { %10 = vsyncpa [#allocation4], 0 }
   0x4   :  { %11 = vsyncpa [#allocation7], 0 }
   0x5   :  { %13 = vsyncpa [#allocation7 + $0x1], 0 }
   0x6   :  { %14 = vsyncpa [#allocation10], 0 }
   0x7   :  { %16 = vsyncpa [#allocation10 + $0x1], 0 }
   0x8   :  { %17 = vsyncpa [#allocation5], 0  ;;  %s1306_s18 = smov 0   ;;  %s1308_s19 = smov 0  }
   0x9   :  { %s1310_s20 = smov 0   ;;  %s1312_s21 = smov 0  }
   0xa   :  { %s1314_s22 = smov 0   ;;  %s1316_s23 = smov 0  }
   0xb LB: > { %s1335_s24 = sadd.s32 4294967295, %s1263_s23   ;;  %s68_s25 = sadd.s32 1, %s1251_s20  ;;  %s1263_s23 = sphi %s1316_s23, %s23_s23   ;;  %s1259_s22 = sphi %s1314_s22, %s1688_s22   ;;  %s1255_s21 = sphi %s1312_s21, %s1687_s21   ;;  %s1251_s20 = sphi %s1310_s20, %s1686_s20   ;;  %s1247_s19 = sphi %s1308_s19, %s1685_s19   ;;  %s1243_s18 = sphi %s1306_s18, %s1684_s18  }
   0xc   : > { %p75_p0 = scmp.ne.s32.totalorder %s1251_s20, %s1247_s19  ;;  %p76_p1 = scmp.eq.s32.totalorder %s1263_s23, 0 }
   0xd   : > { %p81_p2 = scmp.ne.s32.totalorder %s1247_s19, %s1243_s18  ;;  %p1644_p3 = scmp.eq.s32.totalorder %s1335_s24, 0 }
   0xe   : > { %p77_p4 = por %p76_p1, %p75_p0  ;;  %p729_p5 = scmp.ge.s32.totalorder %s1263_s23, 1 }
   0xf   : > { %p1346_p6 = por %p1644_p3, %p81_p2  ;;  %p191_p7 = scmp.lt.s32.totalorder %s1263_s23, 3 }
  0x10   : > { %s1265_s28 = smov [#allocation11]   ;;  %p960_p10 = scmp.lt.s32.totalorder %s1263_s23, 2 }
  0x11   : > { %s1659_s26 = scalar_select %p1346_p6, 1, 0 }
  0x12   : > { %p1351_p8 = pnand %p729_p5, %p191_p7  ;;  %s220_s29 = sshll.u32 %s1265_s28, 4  ;;  %s221_s29 = int_to_ptr.vmem [resolvable:$true] %s220_s29 }
  0x13   : > { %p1364_p12 = pnand %p960_p10, %p77_p4  ;;  %s1663_s4 = sld [smem:[#allocation21_spill]] }
  0x14   : > { %s1660_s27 = scalar_select %p1351_p8, 1, 0 }
  0x15   : > { %p941_p9 = pneg %p1351_p8 }
  0x16   : > { %s1662_s6 = scalar_select %p1364_p12, 1, 0 }
  0x17   : > { %p1360_p11 = pnand %p941_p9, %p1644_p3 }
  0x19   : > { %s1661_s30 = scalar_select %p1360_p11, 1, 0 }
  0x1a   : > { %s1025_s9 = scalar_lea.hbm %s1663_s4, 16  ;;  %p1649_p0 = pneg %p1360_p11 }
  0x1b   : > { %p1026_p13 = scmp.ne.s32.totalorder %s1663_s4, %s1025_s9  ;;  %p1032_p4 = scmp.lt.u32.totalorder %s1025_s9, %s1663_s4 }
  0x1d   : > { %p1028_p1 = pnand %p1649_p0, %p1026_p13 }
  0x1f   : > { %p1029_p2 = pneg %p1028_p1 }
  0x21   : > { %p1034_p5 = pnand %p1032_p4, %p1029_p2 }
  0x23   : > { %1037 = shalt.err (!%p1034_p5)
}
  0x24   : > { %s1038_s14 = scalar_lea.vmem %s221_s29, 16  ;;  %s1045_s15 = scalar_lea.vmem %s221_s29, 32 }
  0x25   : > { %p1039_p7 = scmp.ne.s32.totalorder %s221_s29, %s1038_s14  ;;  %p1046_p3 = scmp.lt.s32.totalorder %s221_s29, %s221_s29 }
  0x26   : > { %p1047_p6 = scmp.lt.s32.totalorder %s1045_s15, %s1038_s14 }
  0x27   : > { %p1041_p9 = pnand %p1039_p7, %p1649_p0 }
  0x28   : > { %p1048_p8 = por %p1047_p6, %p1046_p3 }
  0x29   : > { %p1042_p10 = pneg %p1041_p9 }
  0x2b   : > { %p1049_p12 = pnand %p1048_p8, %p1042_p10 }
  0x2d   : > { %1052 = shalt.err (!%p1049_p12)
}
  0x2e   : > { %947 = dma.hbm_to_vmem [thread:$0]  (!%p1360_p11), %s1663_s4, 16, %s221_s29, [#allocation10]  }
  0x2f   : > { %s32_s18 = sadd.s32 1, %s1259_s22  ;;  %s1648_s28 = sand.u32 1, %s1263_s23  }
  0x30   : > { %p33_p3 = scmp.ge.s32.totalorder %s32_s18, 2  ;;  %s1652_s7 = sand.u32 1, %s1251_s20  }
  0x31   : > { %s752_s8 = sshll.u32 %s1259_s22, 11  ;;  %s1398_s9 = sshll.u32 %s1652_s7, 7 }
  0x32   : > { %s1690_s18 = smov (%p33_p3, %s32_s18), 0  ;;  %s1665_s1 = sld [smem:[#allocation20_spill]] }
  0x33   : > { %1664 = sst [smem:[#allocation18_spill]] %s1690_s18  ;;  %s65_s29 = ssub.s32 %s1259_s22, %s1690_s18 }
  0x34   : > { %p66_p6 = scmp.eq.s32.totalorder %s65_s29, 0  ;;  %s235_s13 = scalar_lea.vmem [#allocation6], %s1398_s9 }
  0x35   : > { %s242_s14 = sshll.u32 %s235_s13, 4  ;;  %s1417_s16 = scalar_lea.sflag [#allocation7], %s1648_s28  ;;  %s1408_s14 = int_to_ptr.vmem [resolvable:$true] %s242_s14 }
  0x36   : > { %s1413_s15 = scalar_select %p66_p6, %s1251_s20, %s68_s25  }
  0x37   : > { %p1667_p12 = scmp.ne.s32.totalorder %s1662_s6, 0 }
  0x38   : > { %s1403_s12 = scalar_lea.hbm %s1665_s1, %s752_s8  ;;  %1666 = sst [smem:[#allocation19_spill]] %s1413_s15 }
  0x39   : > { %s1053_s17 = scalar_lea.hbm %s1403_s12, 2048  ;;  %p1423_p13 = pneg %p1667_p12 }
  0x3a   : > { %p1054_p8 = scmp.ne.s32.totalorder %s1403_s12, %s1053_s17  ;;  %s1058_s29 = scalar_lea.hbm %s1665_s1, 4096 }
  0x3b   : > { %s1668_s8 = scalar_select %p1423_p13, 1, 0 }
  0x3c   : > { %p1056_p1 = pnand %p1423_p13, %p1054_p8  ;;  %p1059_p4 = scmp.lt.u32.totalorder %s1403_s12, %s1665_s1 }
  0x3d   : > { %p1060_p5 = scmp.lt.u32.totalorder %s1058_s29, %s1053_s17  ;;  %p1062_p9 = scmp.lt.u32.totalorder %s1053_s17, %s1403_s12 }
  0x3e   : > { %p1057_p2 = pneg %p1056_p1 }
  0x3f   : > { %p1061_p7 = por %p1060_p5, %p1059_p4 }
  0x41   : > { %p1063_p10 = por %p1062_p9, %p1061_p7 }
  0x43   : > { %p1064_p3 = pnand %p1063_p10, %p1057_p2 }
  0x45   : > { %1067 = shalt.err (!%p1064_p3)
}
  0x46   : > { %s1068_s28 = scalar_lea.vmem %s1408_s14, 2048  ;;  %s1266_s10 = smov [#allocation6]  }
  0x47   : > { %p1069_p6 = scmp.ne.s32.totalorder %s1408_s14, %s1068_s28  ;;  %s1073_s11 = sshll.u32 %s1266_s10, 4  ;;  %s1074_s11 = int_to_ptr.vmem [resolvable:$false] %s1073_s11 }
  0x48   : > { %s1075_s25 = scalar_lea.vmem %s1074_s11, 4096  ;;  %p1076_p0 = scmp.lt.s32.totalorder %s1408_s14, %s1074_s11 }
  0x49   : > { %p1071_p8 = pnand %p1069_p6, %p1423_p13  ;;  %p1077_p11 = scmp.lt.s32.totalorder %s1075_s25, %s1068_s28 }
  0x4b   : > { %p1072_p1 = pneg %p1071_p8  ;;  %p1078_p4 = por %p1077_p11, %p1076_p0 }
  0x4d   : > { %p1079_p5 = pnand %p1078_p4, %p1072_p1 }
  0x4f   : > { %1082 = shalt.err (!%p1079_p5)
}
  0x50   : > { %s1267_s17 = smov 128   ;;  %s1268_s29 = smov 8  }
  0x51   : > { %951 = dma.hbm_to_vmem [thread:$0]  (!%p1667_p12), %s1403_s12, 2048, %s1408_s14, %s1417_s16, %s1267_s17, %s1267_s17, %s1268_s29  }
  0x52   : > { %s273_s13 = scalar_lea.vmem [#allocation9], %s1398_s9  ;;  %s1269_s28 = smov [#allocation3]  }
  0x53   : > { %s279_s10 = sshll.u32 %s273_s13, 4  ;;  %s206_s11 = sshll.u32 %s1269_s28, 4  ;;  %s1451_s10 = int_to_ptr.vmem [resolvable:$true] %s279_s10  ;;  %s207_s11 = int_to_ptr.vmem [resolvable:$true] %s206_s11 }
  0x54   : > { %s736_s25 = sshll.u32 %s1259_s22, 4  ;;  %s1083_s4 = scalar_lea.hbm %s1638_s0, 256 }
  0x55   : > { %p1084_p11 = scmp.ne.s32.totalorder %s1638_s0, %s1083_s4  ;;  %p1669_p0 = scmp.ne.s32.totalorder %s1661_s30, 0 }
  0x56   : > { %p1090_p10 = scmp.lt.u32.totalorder %s1083_s4, %s1638_s0 }
  0x57   : > { %p1670_p2 = pneg %p1669_p0 }
  0x59   : > { %p1086_p7 = pnand %p1084_p11, %p1670_p2 }
  0x5b   : > { %p1087_p9 = pneg %p1086_p7 }
  0x5d   : > { %p1092_p3 = pnand %p1090_p10, %p1087_p9 }
  0x5f   : > { %1095 = shalt.err (!%p1092_p3)
}
  0x60   : > { %s1096_s14 = scalar_lea.vmem %s207_s11, 256  ;;  %p1671_p8 = pmov %p1670_p2 }
  0x61   : > { %p1097_p6 = scmp.ne.s32.totalorder %s207_s11, %s1096_s14  ;;  %p1104_p5 = scmp.lt.s32.totalorder %s207_s11, %s207_s11 }
  0x62   : > { %p1105_p12 = scmp.lt.s32.totalorder %s1096_s14, %s1096_s14 }
  0x63   : > { %p1099_p1 = pnand %p1097_p6, %p1671_p8 }
  0x64   : > { %p1106_p13 = por %p1105_p12, %p1104_p5 }
  0x65   : > { %p1100_p4 = pneg %p1099_p1 }
  0x67   : > { %p1107_p2 = pnand %p1106_p13, %p1100_p4 }
  0x69   : > { %1110 = shalt.err (!%p1107_p2)
}
  0x6a   : > { %944 = dma.hbm_to_vmem [thread:$0]  (!%p1669_p0), %s1638_s0, 256, %s207_s11, [#allocation4], %s1267_s17, %s1267_s17, %s1268_s29  }
  0x6b   : > { %s1480_s15 = scalar_lea.hbm %s1640_s2, %s736_s25  ;;  %s1672_s13 = sand.u32 1, %s1251_s20  }
  0x6c   : > { %s255_s30 = scalar_lea.vmem [#allocation8], %s1672_s13  ;;  %s738_s9 = sshll.u32 %s1259_s22, 7 }
  0x6d   : > { %s262_s28 = sshll.u32 %s255_s30, 4  ;;  %s1111_s12 = scalar_lea.hbm %s1480_s15, 16  ;;  %s263_s28 = int_to_ptr.vmem [resolvable:$true] %s262_s28 }
  0x6e   : > { %p1112_p12 = scmp.ne.s32.totalorder %s1480_s15, %s1111_s12  ;;  %p1673_p13 = scmp.ne.s32.totalorder %s1668_s8, 0 }
  0x6f   : > { %s1116_s1 = scalar_lea.hbm %s1640_s2, 32  ;;  %p1117_p0 = scmp.lt.u32.totalorder %s1480_s15, %s1640_s2 }
  0x70   : > { %p1114_p11 = pnand %p1112_p12, %p1673_p13  ;;  %p1118_p9 = scmp.lt.u32.totalorder %s1116_s1, %s1111_s12 }
  0x71   : > { %p1120_p3 = scmp.lt.u32.totalorder %s1111_s12, %s1480_s15 }
  0x72   : > { %p1115_p7 = pneg %p1114_p11  ;;  %p1119_p10 = por %p1118_p9, %p1117_p0 }
  0x74   : > { %p1121_p6 = por %p1120_p3, %p1119_p10 }
  0x76   : > { %p1122_p8 = pnand %p1121_p6, %p1115_p7 }
  0x78   : > { %1125 = shalt.err (!%p1122_p8)
}
  0x79   : > { %s1126_s18 = scalar_lea.vmem %s263_s28, 16  ;;  %s1270_s7 = smov [#allocation8]  }
  0x7a   : > { %p1127_p1 = scmp.ne.s32.totalorder %s263_s28, %s1126_s18  ;;  %s1131_s13 = sshll.u32 %s1270_s7, 4  ;;  %s1132_s13 = int_to_ptr.vmem [resolvable:$false] %s1131_s13 }
  0x7b   : > { %s1133_s30 = scalar_lea.vmem %s1132_s13, 32  ;;  %p1134_p2 = scmp.lt.s32.totalorder %s263_s28, %s1132_s13 }
  0x7c   : > { %p1129_p4 = pnand %p1127_p1, %p1673_p13  ;;  %p1135_p12 = scmp.lt.s32.totalorder %s1133_s30, %s1126_s18 }
  0x7e   : > { %p1130_p5 = pneg %p1129_p4  ;;  %p1136_p11 = por %p1135_p12, %p1134_p2 }
  0x80   : > { %p1137_p0 = pnand %p1136_p11, %p1130_p5 }
  0x82   : > { %1140 = shalt.err (!%p1137_p0)
}
  0x83   : > { %p1674_p9 = scmp.ne.s32.totalorder %s1662_s6, 0  ;;  %s1506_s14 = scalar_lea.hbm %s1641_s3, %s738_s9 }
  0x84   : > { %s1675_s1 = sand.u32 1, %s1263_s23   ;;  %s1141_s4 = scalar_lea.hbm %s1506_s14, 2048 }
  0x85   : > { %954 = dma.hbm_to_vmem [thread:$0]  (!%p1674_p9), %s1480_s15, 16, %s263_s28, %s1417_s16  }
  0x86   : > { %s1510_s25 = scalar_lea.sflag [#allocation10], %s1675_s1  ;;  %p1142_p7 = scmp.ne.s32.totalorder %s1506_s14, %s1141_s4 }
  0x87   : > { %s1146_s16 = scalar_lea.hbm %s1641_s3, 4096  ;;  %p1147_p6 = scmp.lt.u32.totalorder %s1506_s14, %s1641_s3 }
  0x88   : > { %p1144_p10 = pnand %p1142_p7, %p1673_p13  ;;  %p1148_p8 = scmp.lt.u32.totalorder %s1146_s16, %s1141_s4 }
  0x89   : > { %p1150_p4 = scmp.lt.u32.totalorder %s1141_s4, %s1506_s14 }
  0x8a   : > { %p1145_p3 = pneg %p1144_p10  ;;  %p1149_p1 = por %p1148_p8, %p1147_p6 }
  0x8c   : > { %p1151_p5 = por %p1150_p4, %p1149_p1 }
  0x8e   : > { %p1152_p2 = pnand %p1151_p5, %p1145_p3 }
  0x90   : > { %1155 = shalt.err (!%p1152_p2)
}
  0x91   : > { %s1156_s9 = scalar_lea.vmem %s1451_s10, 2048  ;;  %s1271_s13 = smov [#allocation9]  }
  0x92   : > { %p1157_p12 = scmp.ne.s32.totalorder %s1451_s10, %s1156_s9  ;;  %s1161_s30 = sshll.u32 %s1271_s13, 4  ;;  %s1162_s30 = int_to_ptr.vmem [resolvable:$false] %s1161_s30 }
  0x93   : > { %s1163_s12 = scalar_lea.vmem %s1162_s30, 4096  ;;  %p1164_p7 = scmp.lt.s32.totalorder %s1451_s10, %s1162_s30 }
  0x94   : > { %p1159_p11 = pnand %p1157_p12, %p1673_p13  ;;  %p1165_p10 = scmp.lt.s32.totalorder %s1163_s12, %s1156_s9 }
  0x96   : > { %p1160_p0 = pneg %p1159_p11  ;;  %p1166_p6 = por %p1165_p10, %p1164_p7 }
  0x98   : > { %p1167_p8 = pnand %p1166_p6, %p1160_p0 }
  0x9a   : > { %1170 = shalt.err (!%p1167_p8)
}
  0x9b   : > { %s1272_s11 = smov 256   ;;  %p1676_p13 = scmp.ne.s32.totalorder %s1660_s27, 0 }
  0x9c   : > { %957 = dma.hbm_to_vmem [thread:$0]  (!%p1674_p9), %s1506_s14, 2048, %s1451_s10, %s1510_s25, %s1272_s11, %s1267_s17, %s1268_s29  }
  0x9d   : > { %291 = sbr.rel (%p1676_p13) target bundleno = 743 (0x2e7), region = 40  ;;  %p1677_p3 = scmp.eq.s32.totalorder (!%p1676_p13), %s1335_s24, 0 }
  0xa4   : > { %1222 = dma.done.wait (%p1677_p3), [#allocation4], 256   ;;  %p1678_p1 = pmov %p1677_p3 }
  0xa5   : > { %s297_s8 = sand.u32 1, %s1335_s24   ;;  %s299_s6 = sand.u32 1, %s1247_s19  }
  0xa6   : > { %1224 = vsyncadd (%p1678_p1), [#allocation4], 4294967040  ;;  %s741_s1 = sshll.u32 %s299_s6, 7  ;;  %s298_s4 = scalar_lea.sflag [#allocation7], %s297_s8 }
  0xa7   : > { %s1544_s18 = scalar_lea.vmem [#allocation6], %s741_s1  ;;  %p1679_p4 = scmp.ne.s32.totalorder %s1659_s26, 0 }
  0xa9   : > { %1226 = dma.done.wait (%p1679_p4), %s298_s4, 2064  }
  0xaa   : > { %1228 = vsyncadd (%p1679_p4), %s298_s4, 4294965232  ;;  %s1550_s27 = scalar_lea.vmem [#allocation8], %s299_s6  ;;  %s315_s17 = scalar_lea.sflag [#allocation10], %s297_s8 }
  0xab   : > { %s1552_s29 = scalar_lea.vmem [#allocation9], %s741_s1 }
  0xac   : > { %1230 = dma.done.wait (%p1679_p4), %s315_s17, 2048  }
  0xad   : > { %1232 = vsyncadd (%p1679_p4), %s315_s17, 4294965248  ;;  %p1680_p9 = pmov %p1678_p1 }
  0xae   : > { %p1681_p5 = pmov %p1678_p1 }
  0xaf   : > { %1234 = dma.done.wait (%p1680_p9), [#allocation10], 16  }
  0xb0   : > { %1236 = vsyncadd (%p1681_p5), [#allocation10], 4294967280  ;;  %p744_p2 = scmp.ne.s32.totalorder %s1255_s21, 0 }
  0xb1   : > { %v745_v0 = vld [vmem:[#allocation11] ss:$0 sm:$0xff] (!%p744_p2) }
  0xb2   : > { %359 = sbr.rel (%p744_p2) target bundleno = 185 (0xb9), region = 64  ;;  %367 = vst [vmem:[#allocation2] sm:$0xff] (!%p744_p2), %v745_v0  ;;  %368 = vst [vmem:[#allocation2 + $0x8] sm:$0xff] (!%p744_p2), %v745_v0 }
  0xb9 PF: > { %v371_v1 = vld [vmem:[%s1544_s18] sm:$0xff]  ;;  %v372_v2 = vld [vmem:[%s1544_s18 + $0x8] sm:$0xff]  ;;  %v373_v3 = vld [vmem:[%s1544_s18 + $0x10] sm:$0xff]  ;;  %p747_p12 = scmp.ne.s32.totalorder %s1255_s21, 1 }
  0xba   : > { %v859_v4 = vpack.c.bf16 %v372_v2, %v371_v1  ;;  %v374_v5 = vld [vmem:[%s1544_s18 + $0x18] sm:$0xff]  ;;  %v375_v7 = vld [vmem:[%s1544_s18 + $0x20] sm:$0xff]  ;;  %v376_v8 = vld [vmem:[%s1544_s18 + $0x28] sm:$0xff] }
  0xbb   : > { %v863_v6 = vpack.c.bf16 %v374_v5, %v373_v3  ;;  %v369_v9 = vld [vmem:[#allocation3] sm:$0xff]  ;;  %v487_v10 = vld [vmem:[%s1552_s29] sm:$0xff]  ;;  %v490_v14 = vld [vmem:[%s1552_s29 + $0x18] sm:$0xff]  ;;  %v867_v16 = vpack.c.bf16 %v376_v8, %v375_v7 }
  0xbc   : > { %860 = vmatprep.subr.bf16.mxu0 %v859_v4  ;;  %821 = vmatprep.mubr.f32.mxu0 %v369_v9  ;;  %v488_v11 = vld [vmem:[%s1552_s29 + $0x8] sm:$0xff]  ;;  %v489_v12 = vld [vmem:[%s1552_s29 + $0x10] sm:$0xff]  ;;  %v491_v17 = vld [vmem:[%s1552_s29 + $0x20] sm:$0xff] }
  0xbd   : > { %862 = vmatpush3.bf16.xpose.msra.mxu0 %v859_v4  ;;  %v891_v13 = vpack.c.bf16 %v488_v11, %v487_v10  ;;  %v895_v15 = vpack.c.bf16 %v490_v14, %v489_v12  ;;  %v492_v18 = vld [vmem:[%s1552_s29 + $0x28] sm:$0xff]  ;;  %v378_v20 = vld [vmem:[%s1544_s18 + $0x38] sm:$0xff]  ;;  %v379_v25 = vld [vmem:[%s1544_s18 + $0x40] sm:$0xff] }
  0xbe   : > { %864 = vmatprep.subr.bf16.mxu0 %v863_v6  ;;  %v377_v19 = vld [vmem:[%s1544_s18 + $0x30] sm:$0xff]  ;;  %v899_v21 = vpack.c.bf16 %v492_v18, %v491_v17  ;;  %v494_v24 = vld [vmem:[%s1552_s29 + $0x38] sm:$0xff]  ;;  %v380_v26 = vld [vmem:[%s1544_s18 + $0x48] sm:$0xff] }
  0xbf   : > { %892 = vmatprep.subr.bf16.mxu1 %v891_v13  ;;  %v871_v22 = vpack.c.bf16 %v378_v20, %v377_v19  ;;  %v493_v23 = vld [vmem:[%s1552_s29 + $0x30] sm:$0xff]  ;;  %v875_v28 = vpack.c.bf16 %v380_v26, %v379_v25  ;;  %v495_v29 = vld [vmem:[%s1552_s29 + $0x40] sm:$0xff]  ;;  %v496_v30 = vld [vmem:[%s1552_s29 + $0x48] sm:$0xff] }
  0xc0   : > { %894 = vmatpush3.bf16.xpose.msra.mxu1 %v891_v13  ;;  %v903_v27 = vpack.c.bf16 %v494_v24, %v493_v23  ;;  %v381_v31 = vld [vmem:[%s1544_s18 + $0x50] sm:$0xff]  ;;  %v382_v32 = vld [vmem:[%s1544_s18 + $0x58] sm:$0xff]  ;;  %v907_v33 = vpack.c.bf16 %v496_v30, %v495_v29  ;;  %v383_v35 = vld [vmem:[%s1544_s18 + $0x60] sm:$0xff] }
  0xc1   : > { %896 = vmatprep.subr.bf16.mxu1 %v895_v15  ;;  %v879_v34 = vpack.c.bf16 %v382_v32, %v381_v31  ;;  %v384_v36 = vld [vmem:[%s1544_s18 + $0x68] sm:$0xff]  ;;  %v385_v38 = vld [vmem:[%s1544_s18 + $0x70] sm:$0xff]  ;;  %v386_v39 = vld [vmem:[%s1544_s18 + $0x78] sm:$0xff] }
  0xc2   : > { %v883_v37 = vpack.c.bf16 %v384_v36, %v383_v35  ;;  %v887_v40 = vpack.c.bf16 %v386_v39, %v385_v38  ;;  %v370_v41 = vld [vmem:[#allocation3 + $0x8] sm:$0xff]  ;;  %v499_v45 = vld [vmem:[%s1552_s29 + $0x60] sm:$0xff]  ;;  %v500_v46 = vld [vmem:[%s1552_s29 + $0x68] sm:$0xff] }
  0xc3   : > { %v497_v42 = vld [vmem:[%s1552_s29 + $0x50] sm:$0xff]  ;;  %v498_v43 = vld [vmem:[%s1552_s29 + $0x58] sm:$0xff]  ;;  %v915_v47 = vpack.c.bf16 %v500_v46, %v499_v45  ;;  %v579_v10 = vld [vmem:[#allocation2 + $0x8] sm:$0xff] }
  0xc4   : > { %v911_v44 = vpack.c.bf16 %v498_v43, %v497_v42  ;;  %v501_v48 = vld [vmem:[%s1552_s29 + $0x70] sm:$0xff]  ;;  %v502_v49 = vld [vmem:[%s1552_s29 + $0x78] sm:$0xff] }
  0xc5   : > { %866 = vmatpush3.bf16.xpose.msra.mxu0 %v863_v6  ;;  %v919_v50 = vpack.c.bf16 %v502_v49, %v501_v48  ;;  %v746_v51 = vld [vmem:[%s1550_s27] ss:$0 sm:$0xff] }
  0xc6   : > { %868 = vmatprep.subr.bf16.mxu0 %v867_v16  ;;  %v578_v11 = vld [vmem:[#allocation2] sm:$0xff] }
  0xc8   : > { %898 = vmatpush3.bf16.xpose.msra.mxu1 %v895_v15 }
  0xc9   : > { %900 = vmatprep.subr.bf16.mxu1 %v899_v21 }
  0xcd   : > { %870 = vmatpush3.bf16.xpose.msra.mxu0 %v867_v16 }
  0xce   : > { %872 = vmatprep.subr.bf16.mxu0 %v871_v22 }
  0xd0   : > { %902 = vmatpush3.bf16.xpose.msra.mxu1 %v899_v21 }
  0xd1   : > { %904 = vmatprep.subr.bf16.mxu1 %v903_v27 }
  0xd5   : > { %874 = vmatpush3.bf16.xpose.msra.mxu0 %v871_v22 }
  0xd6   : > { %876 = vmatprep.subr.bf16.mxu0 %v875_v28 }
  0xd8   : > { %906 = vmatpush3.bf16.xpose.msra.mxu1 %v903_v27 }
  0xd9   : > { %908 = vmatprep.subr.bf16.mxu1 %v907_v33 }
  0xdd   : > { %878 = vmatpush3.bf16.xpose.msra.mxu0 %v875_v28 }
  0xde   : > { %880 = vmatprep.subr.bf16.mxu0 %v879_v34 }
  0xe0   : > { %910 = vmatpush3.bf16.xpose.msra.mxu1 %v907_v33 }
  0xe1   : > { %912 = vmatprep.subr.bf16.mxu1 %v911_v44 }
  0xe5   : > { %882 = vmatpush3.bf16.xpose.msra.mxu0 %v879_v34 }
  0xe6   : > { %884 = vmatprep.subr.bf16.mxu0 %v883_v37 }
  0xe8   : > { %914 = vmatpush3.bf16.xpose.msra.mxu1 %v911_v44 }
  0xe9   : > { %916 = vmatprep.subr.bf16.mxu1 %v915_v47 }
  0xed   : > { %886 = vmatpush3.bf16.xpose.msra.mxu0 %v883_v37 }
  0xee   : > { %888 = vmatprep.subr.bf16.mxu0 %v887_v40 }
  0xf0   : > { %918 = vmatpush3.bf16.xpose.msra.mxu1 %v915_v47 }
  0xf1   : > { %920 = vmatprep.subr.bf16.mxu1 %v919_v50 }
  0xf5   : > { %890 = vmatpush3.bf16.xpose.msra.mxu0 %v887_v40 }
  0xf8   : > { %922 = vmatpush3.bf16.xpose.msra.mxu1 %v919_v50 }
  0xfc   : > { %822 = vmatmul.mubr.f32.vlgmr.msra.gmra.mrb[0].mxu0 %v370_v41 }
 0x1cf   : > { %v823_v52 = vpop.f32.mrb[0].mxu0 }
 0x1d0   : > { %v466_v53 = vadd.f32 %v823_v52, %v746_v51  ;;  %v460_v54 = vpop.f32.mrb[1].mxu0 }
 0x1d1   : > { %v461_v55 = vadd.f32 %v746_v51, %v460_v54 }
 0x1d2   : > { %v472_v56 = vmul.f32 0.044715, %v466_v53  ;;  %v470_v7 = vmul.f32 0.5, %v466_v53 }
 0x1d3   : > { %v471_v57 = vmul.f32 0.044715, %v461_v55  ;;  %v469_v5 = vmul.f32 0.5, %v461_v55 }
 0x1d4   : > { %v474_v58 = vmul.f32 %v472_v56, %v466_v53 }
 0x1d5   : > { %v473_v59 = vmul.f32 %v471_v57, %v461_v55 }
 0x1d6   : > { %v476_v60 = vmul.f32 %v474_v58, %v466_v53 }
 0x1d7   : > { %v475_v61 = vmul.f32 %v473_v59, %v461_v55 }
 0x1d8   : > { %v478_v62 = vadd.f32 %v476_v60, %v466_v53 }
 0x1d9   : > { %v477_v63 = vadd.f32 %v475_v61, %v461_v55 }
 0x1da   : > { %v480_v0 = vmul.f32 0.7978846, %v478_v62 }
 0x1db   : > { %v479_v1 = vmul.f32 0.7978846, %v477_v63 }
 0x1dc   : > { %1021 = vtanh.f32 %v480_v0 }
 0x1dd   : > { %1023 = vtanh.f32 %v479_v1 }
 0x1e6   : > { %v1022_v2 = vpop.eup %1021 }
 0x1e7   : > { %v1024_v3 = vpop.eup %1023  ;;  %v484_v4 = vadd.f32 1.0, %v1022_v2 }
 0x1e8   : > { %v483_v6 = vadd.f32 1.0, %v1024_v3 }
 0x1e9   : > { %v486_v9 = vmul.f32 %v484_v4, %v470_v7 }
 0x1ea   : > { %v485_v8 = vmul.f32 %v483_v6, %v469_v5 }
 0x1ec   : > { %856 = vmatprep.mubr.f32.mxu1 %v485_v8 }
 0x1ed   : > { %857 = vmatmul.mubr.f32.vlgmr.msra.gmra.mrb[0].mxu1 %v486_v9 }
 0x2be   : > { %587 = sbr.rel (%p747_p12) target bundleno = 717 (0x2cd), region = 68 }
 0x2c0   : > { %v858_v12 = vpop.f32.mrb[0].mxu1 }
 0x2c1   : > { %v581_v13 = vadd.f32 %v858_v12, %v579_v10  ;;  %v569_v14 = vpop.f32.mrb[1].mxu1 }
 0x2c2   : > { %v580_v15 = vadd.f32 %v578_v11, %v569_v14 }
 0x2c3   : > { %583 = vst [vmem:[#allocation2 + $0x8] sm:$0xff] %v581_v13 }
 0x2c4   : > { %582 = vst [vmem:[#allocation2] sm:$0xff] %v580_v15 }
 0x2ca   : > { %v589_v17 = vld [vmem:[#allocation2 + $0x8] sm:$0xff] }
 0x2cb   : > { %v588_v16 = vld [vmem:[#allocation2] sm:$0xff]  ;;  %591 = vst [vmem:[#allocation12 + $0x8] sm:$0xff] %v589_v17 }
 0x2cc   : > { %590 = vst [vmem:[#allocation12] sm:$0xff] %v588_v16 }
 0x2cd PF: > { %p963_p11 = scmp.eq.s32.totalorder %s1335_s24, 1  ;;  %s1273_s26 = smov [#allocation12]  }
 0x2ce   : > { %s601_s10 = sshll.u32 %s1273_s26, 4  ;;  %s602_s10 = int_to_ptr.vmem [resolvable:$true] %s601_s10 }
 0x2cf   : > { %s1171_s14 = scalar_lea.vmem %s602_s10, 256  ;;  %p1178_p6 = scmp.lt.s32.totalorder %s602_s10, %s602_s10 }
 0x2d0   : > { %p1172_p0 = scmp.ne.s32.totalorder %s602_s10, %s1171_s14  ;;  %p1179_p8 = scmp.lt.s32.totalorder %s1171_s14, %s1171_s14 }
 0x2d2   : > { %p1173_p7 = pnand %p1172_p0, %p963_p11  ;;  %p1180_p13 = por %p1179_p8, %p1178_p6 }
 0x2d4   : > { %p1174_p10 = pneg %p1173_p7 }
 0x2d6   : > { %p1181_p3 = pnand %p1180_p13, %p1174_p10 }
 0x2d8   : > { %1184 = shalt.err (!%p1181_p3)
}
 0x2d9   : > { %s1185_s7 = scalar_lea.hbm %s1643_s5, 256 }
 0x2da   : > { %p1186_p1 = scmp.ne.s32.totalorder %s1643_s5, %s1185_s7  ;;  %p1191_p5 = scmp.lt.u32.totalorder %s1185_s7, %s1643_s5 }
 0x2dc   : > { %p1187_p4 = pnand %p1186_p1, %p963_p11 }
 0x2de   : > { %p1188_p9 = pneg %p1187_p4 }
 0x2e0   : > { %p1193_p2 = pnand %p1191_p5, %p1188_p9 }
 0x2e2   : > { %1196 = shalt.err (!%p1193_p2)
}
 0x2e3   : > { %s1274_s13 = smov 128   ;;  %s1275_s30 = smov 8  }
 0x2e4   : > { %938 = dma.vmem_to_hbm [thread:$0]  (%p963_p11), %s602_s10, 256, %s1643_s5, [#allocation5], %s1274_s13, %s1274_s13, %s1275_s30  }
 0x2e5   : > { %1238 = dma.done.wait (%p963_p11), [#allocation5], 256  }
 0x2e6   : > { %1240 = vsyncadd (%p963_p11), [#allocation5], 4294967040 }
 0x2e7 PF: > { %s23_s23 = sadd.s32 1, %s1263_s23   ;;  %s1682_s8 = sld [smem:[#allocation19_spill]] }
 0x2e8   : > { %p20_p12 = scmp.ge.s32.totalorder %s23_s23, 4   ;;  %s1683_s6 = sld [smem:[#allocation18_spill]] }
 0x2e9   : > { %s1684_s18 = smov %s1247_s19  ;;  %s1685_s19 = smov %s1251_s20 }
 0x2ea   : > { %s1687_s21 = smov %s1259_s22  ;;  %22 = sbr.rel (!%p20_p12) target bundleno = 11 (0xb), region = 120 }
 0x2ed   : > { %s1686_s20 = smov %s1682_s8 }
 0x2ee   : > { %s1688_s22 = smov %s1683_s6 }
 0x2f1   :  { %617 = vsyncpa [#allocation4], 1 }
 0x2f2   :  { %619 = vsyncpa [#allocation4 + $0x1], 1 }
 0x2f3   :  { %620 = vsyncpa [#allocation7], 1 }
 0x2f4   :  { %622 = vsyncpa [#allocation7 + $0x1], 1 }
 0x2f5   :  { %623 = vsyncpa [#allocation10], 1 }
 0x2f6   :  { %625 = vsyncpa [#allocation10 + $0x1], 1 }
 0x2f7   :  { %626 = vsyncpa [#allocation5], 1 }
 0x2f8   :  { %628 = vsyncpa [#allocation5 + $0x1], 1 }

</bundles_post_ra>
